<compile_context>
chip_gen: v7x
topology: tpu7x:2x2x1
jax: 0.10.0
libtpu: 0.0.40
codegen_flags: <defaults>
</compile_context>

<pallas_src>
import jax
import jax.numpy as jnp
from jax.experimental import pallas as pl
from jax.experimental.pallas import tpu as pltpu

# Small stand-ins for the real model sizes (DIMENSIONS=10000 -> padded 10240,
# NUM_LEVELS=100 -> padded 104, size=617 ISOLET features, 26 classes).
DIMENSIONS = 1024
NUM_LEVELS = 16
NUM_FEATURES = 32
NUM_CLASSES = 8
BATCH = 4
TILE_D = 512            # 512-wide D tiles: ~85% of HBM roofline vs ~29% @128


def voicehd_kernel(onehot_ref, id_ref, lvl_ref, w_ref, out_ref):
    d = pl.program_id(0)

    @pl.when(d == 0)
    def _():
        out_ref[...] = jnp.zeros_like(out_ref)

    F, TD = id_ref.shape
    BF = onehot_ref.shape[0]
    B = BF // F

    # Level lookup as a bf16 MXU matmul (one-hot rows select level HVs).
    # Exact: one-hot is 0/1, level HVs are +/-1, f32 accumulate.
    value_hv = jnp.dot(onehot_ref[...], lvl_ref[...],
                       preferred_element_type=jnp.float32)       # (B*F, TD)
    value_hv = value_hv.reshape(B, F, TD)

    # bind (elementwise * id HVs) + multiset (sum over features) on the VPU.
    enc = jnp.sum(value_hv * id_ref[...].astype(jnp.float32)[None, :, :],
                  axis=1)                                         # (B, TD)
    # hard_quantize
    enc_q = jnp.where(enc > 0, 1.0, -1.0).astype(jnp.float32)

    # classify: enc_q @ W.T for this D tile, accumulated across the grid in
    # the resident output block (same block index for every grid step).
    out_ref[...] += jax.lax.dot_general(
        enc_q, w_ref[...], (((1,), (1,)), ((), ())),
        preferred_element_type=jnp.float32)                       # (B, C_pad)


def voicehd_forward(x, id_w, lvl_w, cls_w, *, tile_d=TILE_D):
    B, F = x.shape
    L, D = lvl_w.shape
    C = cls_w.shape[0]

    # --- padding (all zero-padding is logit-neutral, see header comment) ---
    D_pad = pl.cdiv(D, tile_d) * tile_d
    L_pad = max(8, pl.cdiv(L, 8) * 8)          # sublane-aligned level table
    C_pad = pl.cdiv(max(C, 128), 128) * 128    # lane-dense output store

    id_p = jnp.zeros((F, D_pad), jnp.bfloat16).at[:, :D].set(
        id_w.astype(jnp.bfloat16))
    lvl_p = jnp.zeros((L_pad, D_pad), jnp.bfloat16).at[:L, :D].set(
        lvl_w.astype(jnp.bfloat16))
    cls_p = jnp.zeros((C_pad, D_pad), jnp.float32).at[:C, :D].set(
        cls_w.astype(jnp.float32))

    # --- hoisted level one-hot: depends only on x, built once (<1 MB) ---
    idx = jnp.round(jnp.clip(x, 0.0, 1.0) * (L - 1)).astype(jnp.int32)
    idx = jnp.clip(idx, 0, L - 1)              # safety vs NaN/inf in x
    onehot = (jax.lax.broadcasted_iota(jnp.int32, (B, F, L_pad), 2)
              == idx[:, :, None]).astype(jnp.bfloat16).reshape(B * F, L_pad)

    out = pl.pallas_call(
        voicehd_kernel,
        out_shape=jax.ShapeDtypeStruct((B, C_pad), jnp.float32),
        grid_spec=pltpu.PrefetchScalarGridSpec(
            num_scalar_prefetch=0,
            grid=(D_pad // tile_d,),
            in_specs=[
                # constant block index -> loaded once, VMEM-resident
                pl.BlockSpec((B * F, L_pad), lambda d: (0, 0)),
                pl.BlockSpec((F, tile_d), lambda d: (0, d)),
                pl.BlockSpec((L_pad, tile_d), lambda d: (0, d)),
                pl.BlockSpec((C_pad, tile_d), lambda d: (0, d)),
            ],
            out_specs=pl.BlockSpec((B, C_pad), lambda d: (0, 0)),
        ),
        compiler_params=pltpu.CompilerParams(
            # D is a reduction axis -> must stay "arbitrary".
            dimension_semantics=("arbitrary",),
            # Big-tile headroom on 128 MiB parts; stays below v7x's 64 MiB.
            vmem_limit_bytes=48 * 1024 * 1024,
        ),
    )(onehot, id_p, lvl_p, cls_p)
    return out[:, :C]


def init_params(key):
    k_id, k_lo, k_hi, k_t, k_cls = jax.random.split(key, 5)
    # embeddings.Random(size, D): random +/-1 hypervectors.
    id_w = jnp.where(
        jax.random.bernoulli(k_id, 0.5, (NUM_FEATURES, DIMENSIONS)),
        1.0, -1.0).astype(jnp.float32)
    # embeddings.Level(L, D): randomized interpolation between two random HVs.
    lo = jnp.where(jax.random.bernoulli(k_lo, 0.5, (DIMENSIONS,)), 1.0, -1.0)
    hi = jnp.where(jax.random.bernoulli(k_hi, 0.5, (DIMENSIONS,)), 1.0, -1.0)
    thresh = jax.random.uniform(k_t, (DIMENSIONS,))
    span = jnp.linspace(0.0, 1.0, NUM_LEVELS)[:, None]        # (L, 1)
    lvl_w = jnp.where(span >= thresh[None, :], hi[None, :],
                      lo[None, :]).astype(jnp.float32)
    # classify.weight: PyTorch __init__ zero-fills (logits would be all-zero);
    # use small deterministic random values so the final matmul is exercised.
    cls_w = (0.01 * jax.random.normal(k_cls, (NUM_CLASSES, DIMENSIONS))
             ).astype(jnp.float32)
    return id_w, lvl_w, cls_w


def reference_forward(x, id_w, lvl_w, cls_w):
    # Pure-JAX reference mirroring the PyTorch forward.
    L = lvl_w.shape[0]
    idx = jnp.clip(jnp.round(jnp.clip(x, 0.0, 1.0) * (L - 1)).astype(jnp.int32),
                   0, L - 1)
    value_hv = lvl_w[idx]                                     # (B, F, D)
    enc = jnp.sum(id_w[None] * value_hv, axis=1)              # multiset(bind)
    enc_q = jnp.where(enc > 0, 1.0, -1.0)                     # hard_quantize
    return enc_q @ cls_w.T


if __name__ == "__main__":
    key = jax.random.PRNGKey(0)
    kx, kp = jax.random.split(key)
    x = jax.random.uniform(kx, (BATCH, NUM_FEATURES), dtype=jnp.float32)
    id_w, lvl_w, cls_w = init_params(kp)

    logits = jax.block_until_ready(voicehd_forward(x, id_w, lvl_w, cls_w))
    ref = reference_forward(x, id_w, lvl_w, cls_w)

    if logits.shape != (BATCH, NUM_CLASSES):
        raise AssertionError(f"bad output shape {logits.shape}")
    if not jnp.allclose(logits, ref, atol=1e-5, rtol=1e-5):
        raise AssertionError("Pallas kernel output mismatch vs reference")
    print("KERNEL_OK")
</pallas_src>

<mosaic_0001>
module attributes {stable_mosaic.version = 11 : i64} {
  func.func @voicehd_kernel(%arg0: i32, %arg1: memref<128x16xbf16, #tpu.memory_space<vmem>>, %arg2: memref<32x512xbf16, #tpu.memory_space<vmem>>, %arg3: memref<16x512xbf16, #tpu.memory_space<vmem>>, %arg4: memref<128x512xf32, #tpu.memory_space<vmem>>, %arg5: memref<4x128xf32, #tpu.memory_space<vmem>>) attributes {dimension_semantics = [#tpu.dimension_semantics<arbitrary>], iteration_bounds = array<i64: 2>, scalar_prefetch = 0 : i64, scratch_operands = 0 : i64, tpu.core_type = #tpu.core_type<tc>, window_params = [{pipeline_mode = #tpu.pipeline_mode<synchronous>, transform_indices = @transform_0, window_bounds = array<i64: 128, 16>}, {transform_indices = @transform_1, window_bounds = array<i64: 32, 512>}, {transform_indices = @transform_2, window_bounds = array<i64: 16, 512>}, {transform_indices = @transform_3, window_bounds = array<i64: 128, 512>}, {pipeline_mode = #tpu.pipeline_mode<synchronous>, transform_indices = @transform_4, window_bounds = array<i64: 4, 128>}]} {
    %c0_i32 = arith.constant 0 : i32
    %0 = arith.cmpi eq, %arg0, %c0_i32 : i32
    %1 = arith.extui %0 : i1 to i32
    %c0_i32_0 = arith.constant 0 : i32
    %2 = arith.cmpi ne, %1, %c0_i32_0 : i32
    scf.if %2 {
      %cst_17 = arith.constant 0.000000e+00 : f32
      %23 = vector.broadcast %cst_17 : f32 to vector<4x128xf32>
      %c0_18 = arith.constant 0 : index
      %c0_19 = arith.constant 0 : index
      %24 = vector.load %arg5[%c0_18, %c0_19] : memref<4x128xf32, #tpu.memory_space<vmem>>, vector<4x128xf32>
      tpu.vector_store %arg5[%c0_18, %c0_19], %23 {strides = array<i32>} : memref<4x128xf32, #tpu.memory_space<vmem>>, vector<4x128xf32>,
    } else {
    }
    %c0 = arith.constant 0 : index
    %c0_1 = arith.constant 0 : index
    %3 = vector.load %arg1[%c0, %c0_1] : memref<128x16xbf16, #tpu.memory_space<vmem>>, vector<128x16xbf16>
    %c0_2 = arith.constant 0 : index
    %c0_3 = arith.constant 0 : index
    %4 = vector.load %arg3[%c0_2, %c0_3] : memref<16x512xbf16, #tpu.memory_space<vmem>>, vector<16x512xbf16>
    %cst = arith.constant dense<0.000000e+00> : vector<128x512xf32>
    %5 = tpu.matmul %3, %4, %cst {dimension_numbers = #tpu.dot_dimension_numbers<[1], [0], [0], [1], [0, 0, 1, 1], [], []>} : vector<128x16xbf16>, vector<16x512xbf16>, vector<128x512xf32> -> vector<128x512xf32>
    %6 = vector.shape_cast %5 : vector<128x512xf32> to vector<4x32x512xf32>
    %c0_4 = arith.constant 0 : index
    %c0_5 = arith.constant 0 : index
    %7 = vector.load %arg2[%c0_4, %c0_5] : memref<32x512xbf16, #tpu.memory_space<vmem>>, vector<32x512xbf16>
    %8 = arith.extf %7 : vector<32x512xbf16> to vector<32x512xf32>
    %9 = vector.shape_cast %8 : vector<32x512xf32> to vector<1x32x512xf32>
    %10 = vector.broadcast %9 : vector<1x32x512xf32> to vector<4x32x512xf32>
    %11 = arith.mulf %6, %10 : vector<4x32x512xf32>
    %cst_6 = arith.constant dense<0.000000e+00> : vector<4x512xf32>
    %12 = vector.multi_reduction <add>, %11, %cst_6 [1] : vector<4x32x512xf32> to vector<4x512xf32>
    %cst_7 = arith.constant 0.000000e+00 : f32
    %13 = vector.broadcast %cst_7 : f32 to vector<4x512xf32>
    %14 = arith.cmpf ogt, %12, %13 : vector<4x512xf32>
    %cst_8 = arith.constant 1.000000e+00 : f32
    %cst_9 = arith.constant -1.000000e+00 : f32
    %15 = vector.broadcast %cst_8 : f32 to vector<4x512xf32>
    %16 = vector.broadcast %cst_9 : f32 to vector<4x512xf32>
    %17 = arith.select %14, %15, %16 : vector<4x512xi1>, vector<4x512xf32>
    %c0_10 = arith.constant 0 : index
    %c0_11 = arith.constant 0 : index
    %18 = vector.load %arg5[%c0_10, %c0_11] : memref<4x128xf32, #tpu.memory_space<vmem>>, vector<4x128xf32>
    %c0_12 = arith.constant 0 : index
    %c0_13 = arith.constant 0 : index
    %19 = vector.load %arg4[%c0_12, %c0_13] : memref<128x512xf32, #tpu.memory_space<vmem>>, vector<128x512xf32>
    %cst_14 = arith.constant dense<0.000000e+00> : vector<4x128xf32>
    %20 = tpu.matmul %17, %19, %cst_14 {dimension_numbers = #tpu.dot_dimension_numbers<[1], [1], [0], [0], [0, 0, 1, 0], [], []>} : vector<4x512xf32>, vector<128x512xf32>, vector<4x128xf32> -> vector<4x128xf32>
    %21 = arith.addf %18, %20 : vector<4x128xf32>
    %c0_15 = arith.constant 0 : index
    %c0_16 = arith.constant 0 : index
    %22 = vector.load %arg5[%c0_15, %c0_16] : memref<4x128xf32, #tpu.memory_space<vmem>>, vector<4x128xf32>
    tpu.vector_store %arg5[%c0_15, %c0_16], %21 {strides = array<i32>} : memref<4x128xf32, #tpu.memory_space<vmem>>, vector<4x128xf32>,
    return
  }
  func.func @transform_0(%arg0: i32) -> (i32, i32) {
    %c0_i32 = arith.constant 0 : i32
    %c0_i32_0 = arith.constant 0 : i32
    %c0_i32_1 = arith.constant 0 : i32
    return %c0_i32, %c0_i32_0 : i32, i32
  }
  func.func @transform_1(%arg0: i32) -> (i32, i32) {
    %c0_i32 = arith.constant 0 : i32
    %c0_i32_0 = arith.constant 0 : i32
    return %c0_i32, %arg0 : i32, i32
  }
  func.func @transform_2(%arg0: i32) -> (i32, i32) {
    %c0_i32 = arith.constant 0 : i32
    %c0_i32_0 = arith.constant 0 : i32
    return %c0_i32, %arg0 : i32, i32
  }
  func.func @transform_3(%arg0: i32) -> (i32, i32) {
    %c0_i32 = arith.constant 0 : i32
    %c0_i32_0 = arith.constant 0 : i32
    return %c0_i32, %arg0 : i32, i32
  }
  func.func @transform_4(%arg0: i32) -> (i32, i32) {
    %c0_i32 = arith.constant 0 : i32
    %c0_i32_0 = arith.constant 0 : i32
    %c0_i32_1 = arith.constant 0 : i32
    return %c0_i32, %c0_i32_0 : i32, i32
  }
}

</mosaic_0001>

<bundles_post_ra>
// kernel: tpu_custom_call.1
= control target key start
LH: loop header
LB: loop body
LE: loop exit
PB: predicated region body
PF: predicated region fallthrough
CT: control target
= control target key end

     0   :  { %9 = vsyncpa [#allocation3], 0  ;;  %s1999_s0 = inlined_call_operand.vmem [shape: bf16[128,16], index: 0, kind: input, shape index: {}]   ;;  %s2000_s1 = inlined_call_operand.hbm [shape: bf16[32,1024], index: 1, kind: input, shape index: {}]   ;;  %s2001_s2 = inlined_call_operand.vmem [shape: bf16[16,1024], index: 2, kind: input, shape index: {}]   ;;  %s2002_s3 = inlined_call_operand.hbm [shape: f32[128,1024], index: 3, kind: input, shape index: {}]   ;;  %s2003_s4 = inlined_call_operand.hbm [shape: f32[4,128], index: 4, kind: output, shape index: {}]  }
   0x1   :  { %11 = vsyncpa [#allocation3 + $0x1], 0 }
   0x2   :  { %12 = vsyncpa [#allocation7], 0 }
   0x3   :  { %14 = vsyncpa [#allocation7 + $0x1], 0 }
   0x4   :  { %15 = vsyncpa [#allocation4], 0  ;;  %s1577_s15 = smov 0   ;;  %s1579_s16 = smov 0  }
   0x5   :  { %s1581_s17 = smov 0   ;;  %s1583_s18 = smov 0  }
   0x6 LB: > { %s1596_s19 = sadd.s32 4294967295, %s1539_s18   ;;  %s1599_s20 = sadd.s32 1, %s1539_s18   ;;  %s1539_s18 = sphi %s1583_s18, %s2009_s18   ;;  %s1535_s17 = sphi %s1581_s17, %s2008_s17   ;;  %s1531_s16 = sphi %s1579_s16, %s2007_s16   ;;  %s1527_s15 = sphi %s1577_s15, %s2006_s15  }
   0x7   : > { %s46_s21 = ssub.s32 %s1539_s18, %s1599_s20  ;;  %s49_s22 = sadd.s32 1, %s1535_s17 }
   0x8   : > { %p47_p0 = scmp.eq.s32.totalorder %s46_s21, 0  ;;  %p56_p1 = scmp.ne.s32.totalorder %s1535_s17, %s1531_s16 }
   0x9   : > { %p57_p2 = scmp.eq.s32.totalorder %s1539_s18, 0  ;;  %p62_p3 = scmp.ne.s32.totalorder %s1531_s16, %s1527_s15 }
   0xa   : > { %s1609_s23 = scalar_select %p47_p0, %s1535_s17, %s49_s22  }
   0xb   : > { %p1611_p4 = por %p57_p2, %p56_p1  ;;  %p63_p5 = scmp.eq.s32.totalorder %s1596_s19, 0 }
   0xc   : > { %p1236_p7 = scmp.ge.s32.totalorder %s1539_s18, 2 }
   0xd   : > { %p1616_p6 = por %p63_p5, %p62_p3  ;;  %s1622_s26 = sand.u32 (!%p1236_p7), 1, %s1535_s17  }
   0xe   : > { %158 = sbr.rel (%p1236_p7) target bundleno = 72 (0x48), region = 20  ;;  %s1283_s27 = sshll.u32 (!%p1236_p7), %s1539_s18, 8 }
   0xf   : > { %s1237_s28 = sshll.u32 (!%p1236_p7), %s1622_s26, 6  ;;  %s1629_s5 = scalar_lea.hbm (!%p1236_p7), %s2000_s1, %s1283_s27 }
  0x10   : > { %s166_s6 = scalar_lea.vmem (!%p1236_p7), [#allocation2], %s1237_s28  ;;  %s163_s8 = scalar_lea.sflag (!%p1236_p7), [#allocation3], %s1622_s26 }
  0x11   : > { %s173_s7 = sshll.u32 (!%p1236_p7), %s166_s6, 4  ;;  %s1415_s9 = scalar_lea.hbm (!%p1236_p7), %s1629_s5, 1024  ;;  %s1631_s7 = int_to_ptr.vmem [resolvable:$true] %s173_s7 }
  0x12   : > { %p1416_p8 = scmp.ne.s32.totalorder (!%p1236_p7), %s1629_s5, %s1415_s9  ;;  %s1419_s12 = scalar_lea.hbm (!%p1236_p7), %s2000_s1, 2048 }
  0x13   : > { %p1420_p11 = scmp.lt.u32.totalorder (!%p1236_p7), %s1629_s5, %s2000_s1  ;;  %p1421_p12 = scmp.lt.u32.totalorder (!%p1236_p7), %s1419_s12, %s1415_s9 }
  0x14   : > { %p1417_p9 = pnand (!%p1236_p7), %p1416_p8, %p1611_p4  ;;  %p1423_p0 = scmp.lt.u32.totalorder (!%p1236_p7), %s1415_s9, %s1629_s5 }
  0x15   : > { %p1422_p13 = por %p1421_p12, %p1420_p11 }
  0x16   : > { %p1418_p10 = pneg %p1417_p9 }
  0x17   : > { %p1424_p1 = por %p1423_p0, %p1422_p13 }
  0x19   : > { %p1425_p2 = pnand %p1424_p1, %p1418_p10 }
  0x1b   : > { %1428 = shalt.err (!%p1425_p2)
}
  0x1c   : > { %s1429_s15 = scalar_lea.vmem %s1631_s7, 1024  ;;  %s1541_s21 = smov [#allocation2]  }
  0x1d   : > { %p1430_p3 = scmp.ne.s32.totalorder %s1631_s7, %s1429_s15  ;;  %s1433_s22 = sshll.u32 %s1541_s21, 4  ;;  %s1434_s22 = int_to_ptr.vmem [resolvable:$false] %s1433_s22 }
  0x1e   : > { %s1435_s27 = scalar_lea.vmem %s1434_s22, 2048  ;;  %p1436_p8 = scmp.lt.s32.totalorder %s1631_s7, %s1434_s22 }
  0x1f   : > { %p1431_p5 = pnand %p1430_p3, %p1611_p4  ;;  %p1437_p9 = scmp.lt.s32.totalorder %s1435_s27, %s1429_s15 }
  0x21   : > { %p1432_p7 = pneg %p1431_p5  ;;  %p1438_p11 = por %p1437_p9, %p1436_p8 }
  0x23   : > { %p1439_p12 = pnand %p1438_p11, %p1432_p7 }
  0x25   : > { %1442 = shalt.err (!%p1439_p12)
}
  0x26   : > { %s1542_s28 = smov 512   ;;  %s1543_s29 = smov 256  }
  0x27   : > { %s1544_s30 = smov 16   ;;  %182 = sbr.rel (!%p1611_p4) target bundleno = 46 (0x2e), region = 28 }
  0x28   : > { %1350 = dma.hbm_to_vmem [thread:$0]  (%p1611_p4), %s1629_s5, 1024, %s1631_s7, %s163_s8, %s1542_s28, %s1543_s29, %s1544_s30  }
  0x29   : > { %s1240_s6 = sshll.u32 (%p1611_p4), %s1622_s26, 5  ;;  %s1284_s9 = sshll.u32 (%p1611_p4), %s1539_s18, 4 }
  0x2a   : > { %s189_s12 = scalar_lea.vmem (%p1611_p4), %s2001_s2, %s1284_s9  ;;  %s186_s13 = scalar_lea.vmem (%p1611_p4), [#allocation5], %s1240_s6 }
  0x2b   : > { %v202_v0 = vld [vmem:[%s189_s12] sm:$0xff] (%p1611_p4)  ;;  %v204_v1 = vld [vmem:[%s189_s12 + $0x8] sm:$0xff] (%p1611_p4) }
  0x2c   : > { %v206_v2 = vld [vmem:[%s189_s12 + $0x20] sm:$0xff] (%p1611_p4)  ;;  %203 = vst [vmem:[%s186_s13] sm:$0xff] (%p1611_p4), %v202_v0  ;;  %205 = vst [vmem:[%s186_s13 + $0x8] sm:$0xff] (%p1611_p4), %v204_v1  ;;  %v208_v3 = vld [vmem:[%s189_s12 + $0x28] sm:$0xff] (%p1611_p4) }
  0x2d   : > { %207 = vst [vmem:[%s186_s13 + $0x10] sm:$0xff] (%p1611_p4), %v206_v2  ;;  %209 = vst [vmem:[%s186_s13 + $0x18] sm:$0xff] (%p1611_p4), %v208_v3 }
  0x2e PF: > { %s1243_s5 = sshll.u32 %s1622_s26, 9  ;;  %s1285_s7 = sshll.u32 %s1539_s18, 9 }
  0x2f   : > { %s1670_s15 = scalar_lea.hbm %s2002_s3, %s1285_s7  ;;  %s220_s21 = scalar_lea.vmem [#allocation6], %s1243_s5 }
  0x30   : > { %s227_s22 = sshll.u32 %s220_s21, 4  ;;  %s217_s27 = scalar_lea.sflag [#allocation7], %s1622_s26  ;;  %s1672_s22 = int_to_ptr.vmem [resolvable:$true] %s227_s22 }
  0x31   : > { %s1443_s29 = scalar_lea.hbm %s1670_s15, 8192  ;;  %s1447_s9 = scalar_lea.hbm %s2002_s3, 16384 }
  0x32   : > { %p1444_p10 = scmp.ne.s32.totalorder %s1670_s15, %s1443_s29  ;;  %p1448_p1 = scmp.lt.u32.totalorder %s1670_s15, %s2002_s3 }
  0x33   : > { %p1449_p2 = scmp.lt.u32.totalorder %s1447_s9, %s1443_s29  ;;  %p1451_p5 = scmp.lt.u32.totalorder %s1443_s29, %s1670_s15 }
  0x34   : > { %p1445_p13 = pnand %p1444_p10, %p1611_p4 }
  0x35   : > { %p1450_p3 = por %p1449_p2, %p1448_p1 }
  0x36   : > { %p1446_p0 = pneg %p1445_p13 }
  0x37   : > { %p1452_p7 = por %p1451_p5, %p1450_p3 }
  0x39   : > { %p1453_p8 = pnand %p1452_p7, %p1446_p0 }
  0x3b   : > { %1456 = shalt.err (!%p1453_p8)
}
  0x3c   : > { %s1457_s12 = scalar_lea.vmem %s1672_s22, 8192  ;;  %s1545_s13 = smov [#allocation6]  }
  0x3d   : > { %p1458_p9 = scmp.ne.s32.totalorder %s1672_s22, %s1457_s12  ;;  %s1461_s5 = sshll.u32 %s1545_s13, 4  ;;  %s1462_s5 = int_to_ptr.vmem [resolvable:$false] %s1461_s5 }
  0x3e   : > { %s1463_s7 = scalar_lea.vmem %s1462_s5, 16384  ;;  %p1464_p10 = scmp.lt.s32.totalorder %s1672_s22, %s1462_s5 }
  0x3f   : > { %p1459_p11 = pnand %p1458_p9, %p1611_p4  ;;  %p1465_p13 = scmp.lt.s32.totalorder %s1463_s7, %s1457_s12 }
  0x41   : > { %p1460_p12 = pneg %p1459_p11  ;;  %p1466_p1 = por %p1465_p13, %p1464_p10 }
  0x43   : > { %p1467_p2 = pnand %p1466_p1, %p1460_p12 }
  0x45   : > { %1470 = shalt.err (!%p1467_p2)
}
  0x46   : > { %s1546_s8 = smov 1024   ;;  %s1547_s14 = smov 32  }
  0x47   : > { %1351 = dma.hbm_to_vmem [thread:$0]  (%p1611_p4), %s1670_s15, 8192, %s1672_s22, %s217_s27, %s1546_s8, %s1542_s28, %s1547_s14  }
  0x48 PF: > { %p1246_p0 = scmp.ge.s32.totalorder %s1539_s18, 1  ;;  %p235_p3 = scmp.lt.s32.totalorder %s1539_s18, 3 }
  0x4a   : > { %p236_p5 = pnand %p1246_p0, %p235_p3 }
  0x4b   : > { %s241_s21 = sand.u32 (!%p236_p5), 1, %s1531_s16  }
  0x4c   : > { %239 = sbr.rel (%p236_p5) target bundleno = 627 (0x273), region = 55  ;;  %s1247_s29 = sshll.u32 (!%p236_p5), %s241_s21, 6 }
  0x4d   : > { %s242_s30 = scalar_lea.sflag (!%p236_p5), [#allocation3], %s241_s21  ;;  %s1702_s6 = scalar_lea.vmem (!%p236_p5), [#allocation2], %s1247_s29 }
  0x53   : > { %1514 = dma.done.wait (%p1616_p6), %s242_s30, 1024  }
  0x54   : > { %1516 = vsyncadd (%p1616_p6), %s242_s30, 4294966272  ;;  %s1248_s24 = sshll.u32 %s241_s21, 5  ;;  %s1249_s26 = sshll.u32 %s241_s21, 9 }
  0x55   : > { %s253_s28 = scalar_lea.vmem [#allocation5], %s1248_s24  ;;  %s258_s15 = scalar_lea.sflag [#allocation7], %s241_s21 }
  0x56   : > { %s1708_s18 = scalar_lea.vmem [#allocation6], %s1249_s26 }
  0x57   : > { %1518 = dma.done.wait (%p1616_p6), %s258_s15, 8192  }
  0x58   : > { %1520 = vsyncadd (%p1616_p6), %s258_s15, 4294959104  ;;  %p1250_p4 = scmp.ne.s32.totalorder %s1596_s19, 0 }
  0x59   : > { %v1548_v4 = vmov (!%p1250_p4), 0.0  }
  0x5a   : > { %297 = sbr.rel (%p1250_p4) target bundleno = 97 (0x61), region = 71  ;;  %298 = vst [vmem:[#allocation8] sm:$0xf] (!%p1250_p4), %v1548_v4 }
  0x61 PF: > { %v1401_v5 = vld [vmem:[%s253_s28 + $0x4] ss:$16 sps:$4 sm:$0xff]   ;;  %v1403_v6 = vld [vmem:[%s253_s28 + $0xc] ss:$16 sps:$4 sm:$0xff]   ;;  %v1549_v7 = vmov 0   ;;  %vm379_vm0 = vcmask 130048  }
  0x62   : > { %436 = vmatprep.mubr.bf16.mxu0 %v1549_v7  ;;  %549 = vmatprep.mubr.bf16.mxu1 %v1549_v7  ;;  %v1405_v8 = vld [vmem:[%s253_s28] ss:$16 sps:$4 sm:$0xff]   ;;  %v1406_v9 = vld [vmem:[%s253_s28 + $0x8] ss:$16 sps:$4 sm:$0xff]   ;;  %vm975_vm5 = vcmask 1041409   ;;  %vm977_vm10 = vcmask 1042434  }
  0x63   : > { %404 = vmatprep.subr.bf16.mxu0 %v1401_v5  ;;  %517 = vmatprep.subr.bf16.mxu1 %v1403_v6  ;;  %v1407_v10 = vld [vmem:[%s1999_s0] sm:$0xff]   ;;  %v1408_v11 = vld [vmem:[%s1999_s0 + $0x8] sm:$0xff]   ;;  %v1409_v12 = vld [vmem:[%s1999_s0 + $0x10] sm:$0xff]   ;;  %vm979_vm15 = vcmask 1043459   ;;  %p1358_p6 = scmp.eq.s32.totalorder %s1596_s19, 1 }
  0x64   : > { %405 = vmatpush1.bf16.msra.mxu0 %v1405_v8  ;;  %518 = vmatpush1.bf16.msra.mxu1 %v1406_v9  ;;  %v1410_v13 = vld [vmem:[%s1999_s0 + $0x18] sm:$0xff]   ;;  %v1411_v14 = vld [vmem:[%s1999_s0 + $0x20] sm:$0xff]   ;;  %v1412_v15 = vld [vmem:[%s1999_s0 + $0x28] sm:$0xff]  }
  0x65   : > { %v1413_v16 = vld [vmem:[%s1999_s0 + $0x30] sm:$0xff]   ;;  %v1414_v17 = vld [vmem:[%s1999_s0 + $0x38] sm:$0xff]   ;;  %v896_v18 = vld [vmem:[%s1708_s18 + $0x8] sm:$0xff] }
  0x66   : > { %v900_v19 = vld [vmem:[%s1708_s18 + $0x28] sm:$0xff]  ;;  %v898_v20 = vld [vmem:[%s1708_s18 + $0x18] sm:$0xff]  ;;  %v895_v23 = vld [vmem:[%s1708_s18] sm:$0xff] }
  0x67   : > { %1263 = vmatmul.mubr.msk.bf16.vlgmr.msra.gmra.mrb[0].mxu0 %vm379_vm0, %v1407_v10  ;;  %1271 = vmatmul.mubr.msk.bf16.vlgmr.msra.gmra.mrb[0].mxu1 %vm379_vm0, %v1407_v10  ;;  %v1286_v21 = vpack.c.bf16 %v900_v19, %v896_v18  ;;  %v902_v22 = vld [vmem:[%s1708_s18 + $0x38] sm:$0xff]  ;;  %v899_v24 = vld [vmem:[%s1708_s18 + $0x20] sm:$0xff]  ;;  %v897_v27 = vld [vmem:[%s1708_s18 + $0x10] sm:$0xff] }
  0x68   : > { %446 = vmatprep.mubr.bf16.mxu0 %v1549_v7  ;;  %559 = vmatprep.mubr.bf16.mxu1 %v1549_v7  ;;  %v1318_v25 = vpack.c.bf16 %v902_v22, %v898_v20  ;;  %v1288_v26 = vpack.c.bf16 %v899_v24, %v895_v23  ;;  %v901_v28 = vld [vmem:[%s1708_s18 + $0x30] sm:$0xff]  ;;  %v904_v30 = vld [vmem:[%s1708_s18 + $0x48] sm:$0xff]  ;;  %v906_v32 = vld [vmem:[%s1708_s18 + $0x58] sm:$0xff] }
  0x69   : > { %1287 = vmatprep.subr.bf16.mxu0 %v1286_v21  ;;  %v1320_v29 = vpack.c.bf16 %v901_v28, %v897_v27  ;;  %v908_v31 = vld [vmem:[%s1708_s18 + $0x68] sm:$0xff]  ;;  %v910_v34 = vld [vmem:[%s1708_s18 + $0x78] sm:$0xff]  ;;  %v903_v35 = vld [vmem:[%s1708_s18 + $0x40] sm:$0xff] }
  0x6a   : > { %1319 = vmatprep.subr.bf16.mxu1 %v1318_v25  ;;  %v1290_v33 = vpack.c.bf16 %v908_v31, %v904_v30  ;;  %v907_v36 = vld [vmem:[%s1708_s18 + $0x60] sm:$0xff]  ;;  %v1322_v37 = vpack.c.bf16 %v910_v34, %v906_v32  ;;  %v905_v39 = vld [vmem:[%s1708_s18 + $0x50] sm:$0xff]  ;;  %v912_v42 = vld [vmem:[%s1708_s18 + $0x88] sm:$0xff] }
  0x6b   : > { %v1292_v38 = vpack.c.bf16 %v907_v36, %v903_v35  ;;  %v909_v40 = vld [vmem:[%s1708_s18 + $0x70] sm:$0xff]  ;;  %v916_v43 = vld [vmem:[%s1708_s18 + $0xa8] sm:$0xff]  ;;  %v914_v44 = vld [vmem:[%s1708_s18 + $0x98] sm:$0xff] }
  0x6c   : > { %v1324_v41 = vpack.c.bf16 %v909_v40, %v905_v39  ;;  %v1294_v45 = vpack.c.bf16 %v916_v43, %v912_v42  ;;  %v918_v46 = vld [vmem:[%s1708_s18 + $0xb8] sm:$0xff]  ;;  %v911_v47 = vld [vmem:[%s1708_s18 + $0x80] sm:$0xff]  ;;  %v913_v51 = vld [vmem:[%s1708_s18 + $0x90] sm:$0xff] }
  0x6d   : > { %1289 = vmatpush1.bf16.xpose.msra.mxu0 %v1288_v26  ;;  %1321 = vmatpush1.bf16.xpose.msra.mxu1 %v1320_v29  ;;  %v915_v48 = vld [vmem:[%s1708_s18 + $0xa0] sm:$0xff]  ;;  %v1326_v49 = vpack.c.bf16 %v918_v46, %v914_v44  ;;  %v917_v52 = vld [vmem:[%s1708_s18 + $0xb0] sm:$0xff]  ;;  %v920_v54 = vld [vmem:[%s1708_s18 + $0xc8] sm:$0xff] }
  0x6e   : > { %1291 = vmatprep.subr.bf16.mxu0 %v1290_v33  ;;  %1323 = vmatprep.subr.bf16.mxu1 %v1322_v37  ;;  %v1296_v50 = vpack.c.bf16 %v915_v48, %v911_v47  ;;  %v1328_v53 = vpack.c.bf16 %v917_v52, %v913_v51  ;;  %v924_v55 = vld [vmem:[%s1708_s18 + $0xe8] sm:$0xff]  ;;  %v922_v56 = vld [vmem:[%s1708_s18 + $0xd8] sm:$0xff]  ;;  %v919_v59 = vld [vmem:[%s1708_s18 + $0xc0] sm:$0xff] }
  0x6f   : > { %1264 = vmatmul.mubr.msk.bf16.gmra.mrb[4].mxu0 %vm379_vm0, %v1408_v11  ;;  %1272 = vmatmul.mubr.msk.bf16.gmra.mrb[4].mxu1 %vm379_vm0, %v1408_v11  ;;  %v1298_v57 = vpack.c.bf16 %v924_v55, %v920_v54  ;;  %v926_v58 = vld [vmem:[%s1708_s18 + $0xf8] sm:$0xff]  ;;  %v923_v60 = vld [vmem:[%s1708_s18 + $0xe0] sm:$0xff]  ;;  %v921_v63 = vld [vmem:[%s1708_s18 + $0xd0] sm:$0xff] }
  0x70   : > { %456 = vmatprep.mubr.bf16.mxu0 %v1549_v7  ;;  %569 = vmatprep.mubr.bf16.mxu1 %v1549_v7  ;;  %v1330_v61 = vpack.c.bf16 %v926_v58, %v922_v56  ;;  %v1300_v62 = vpack.c.bf16 %v923_v60, %v919_v59  ;;  %v925_v0 = vld [vmem:[%s1708_s18 + $0xf0] sm:$0xff]  ;;  %v928_v2 = vld [vmem:[%s1708_s18 + $0x108] sm:$0xff]  ;;  %v930_v4 = vld [vmem:[%s1708_s18 + $0x118] sm:$0xff] }
  0x71   : > { %v1332_v1 = vpack.c.bf16 %v925_v0, %v921_v63  ;;  %v932_v3 = vld [vmem:[%s1708_s18 + $0x128] sm:$0xff]  ;;  %v934_v6 = vld [vmem:[%s1708_s18 + $0x138] sm:$0xff]  ;;  %v931_v8 = vld [vmem:[%s1708_s18 + $0x120] sm:$0xff] }
  0x72   : > { %v1302_v5 = vpack.c.bf16 %v932_v3, %v928_v2  ;;  %v1334_v9 = vpack.c.bf16 %v934_v6, %v930_v4  ;;  %v929_v11 = vld [vmem:[%s1708_s18 + $0x110] sm:$0xff]  ;;  %v942_v18 = vld [vmem:[%s1708_s18 + $0x178] sm:$0xff]  ;;  %v935_v19 = vld [vmem:[%s1708_s18 + $0x140] sm:$0xff] }
  0x73   : > { %v939_v20 = vld [vmem:[%s1708_s18 + $0x160] sm:$0xff]  ;;  %v937_v23 = vld [vmem:[%s1708_s18 + $0x150] sm:$0xff]  ;;  %v944_v26 = vld [vmem:[%s1708_s18 + $0x188] sm:$0xff] }
  0x74   : > { %v1308_v22 = vpack.c.bf16 %v939_v20, %v935_v19  ;;  %v941_v24 = vld [vmem:[%s1708_s18 + $0x170] sm:$0xff]  ;;  %v948_v27 = vld [vmem:[%s1708_s18 + $0x1a8] sm:$0xff]  ;;  %v946_v28 = vld [vmem:[%s1708_s18 + $0x198] sm:$0xff] }
  0x75   : > { %1293 = vmatpush1.bf16.xpose.msra.mxu0 %v1292_v38  ;;  %1325 = vmatpush1.bf16.xpose.msra.mxu1 %v1324_v41  ;;  %v1340_v25 = vpack.c.bf16 %v941_v24, %v937_v23  ;;  %v1310_v29 = vpack.c.bf16 %v948_v27, %v944_v26  ;;  %v950_v30 = vld [vmem:[%s1708_s18 + $0x1b8] sm:$0xff]  ;;  %v943_v31 = vld [vmem:[%s1708_s18 + $0x180] sm:$0xff]  ;;  %v945_v35 = vld [vmem:[%s1708_s18 + $0x190] sm:$0xff] }
  0x76   : > { %1295 = vmatprep.subr.bf16.mxu0 %v1294_v45  ;;  %1327 = vmatprep.subr.bf16.mxu1 %v1326_v49  ;;  %v947_v32 = vld [vmem:[%s1708_s18 + $0x1a0] sm:$0xff]  ;;  %v1342_v33 = vpack.c.bf16 %v950_v30, %v946_v28  ;;  %v949_v36 = vld [vmem:[%s1708_s18 + $0x1b0] sm:$0xff]  ;;  %v952_v38 = vld [vmem:[%s1708_s18 + $0x1c8] sm:$0xff] }
  0x77   : > { %1265 = vmatmul.mubr.msk.bf16.gmra.mrb[8].mxu0 %vm379_vm0, %v1409_v12  ;;  %1273 = vmatmul.mubr.msk.bf16.gmra.mrb[8].mxu1 %vm379_vm0, %v1409_v12  ;;  %v933_v12 = vld [vmem:[%s1708_s18 + $0x130] sm:$0xff]  ;;  %v1312_v34 = vpack.c.bf16 %v947_v32, %v943_v31  ;;  %v1344_v37 = vpack.c.bf16 %v949_v36, %v945_v35  ;;  %v956_v39 = vld [vmem:[%s1708_s18 + $0x1e8] sm:$0xff]  ;;  %v954_v40 = vld [vmem:[%s1708_s18 + $0x1d8] sm:$0xff] }
  0x78   : > { %466 = vmatprep.mubr.bf16.mxu0 %v1549_v7  ;;  %579 = vmatprep.mubr.bf16.mxu1 %v1549_v7  ;;  %v1314_v41 = vpack.c.bf16 %v956_v39, %v952_v38  ;;  %v958_v42 = vld [vmem:[%s1708_s18 + $0x1f8] sm:$0xff]  ;;  %v951_v43 = vld [vmem:[%s1708_s18 + $0x1c0] sm:$0xff]  ;;  %v953_v47 = vld [vmem:[%s1708_s18 + $0x1d0] sm:$0xff] }
  0x79   : > { %v955_v44 = vld [vmem:[%s1708_s18 + $0x1e0] sm:$0xff]  ;;  %v1346_v45 = vpack.c.bf16 %v958_v42, %v954_v40  ;;  %v957_v48 = vld [vmem:[%s1708_s18 + $0x1f0] sm:$0xff]  ;;  %v631_v51 = vld [vmem:[%s1702_s6 + $0x8] sm:$0xff] }
  0x7a   : > { %v1316_v46 = vpack.c.bf16 %v955_v44, %v951_v43  ;;  %v1348_v49 = vpack.c.bf16 %v957_v48, %v953_v47  ;;  %v632_v52 = vld [vmem:[%s1702_s6 + $0x10] sm:$0xff]  ;;  %v1825_v55 = vunpack.c.l.bf16 %v631_v51  ;;  %v634_v4 = vld [vmem:[%s1702_s6 + $0x20] sm:$0xff] }
  0x7b   : > { %v1827_v56 = vunpack.c.l.bf16 %v632_v52  ;;  %v1851_v20 = vunpack.c.l.bf16 %v634_v4  ;;  %v1855_v24 = vunpack.c.h.bf16 %v634_v4 }
  0x7d   : > { %1297 = vmatpush1.bf16.xpose.msra.mxu0 %v1296_v50  ;;  %1329 = vmatpush1.bf16.xpose.msra.mxu1 %v1328_v53  ;;  %v630_v50 = vld [vmem:[%s1702_s6] sm:$0xff]  ;;  %v633_v53 = vld [vmem:[%s1702_s6 + $0x18] sm:$0xff] }
  0x7e   : > { %1299 = vmatprep.subr.bf16.mxu0 %v1298_v57  ;;  %1331 = vmatprep.subr.bf16.mxu1 %v1330_v61  ;;  %v1823_v54 = vunpack.c.l.bf16 %v630_v50  ;;  %v1829_v57 = vunpack.c.l.bf16 %v633_v53  ;;  %v1831_v60 = vunpack.c.h.bf16 %v630_v50  ;;  %v1833_v61 = vunpack.c.h.bf16 %v631_v51 }
  0x7f   : > { %1266 = vmatmul.mubr.msk.bf16.gmra.mrb[12].mxu0 %vm379_vm0, %v1410_v13  ;;  %1274 = vmatmul.mubr.msk.bf16.gmra.mrb[12].mxu1 %vm379_vm0, %v1410_v13  ;;  %v1336_v13 = vpack.c.bf16 %v933_v12, %v929_v11  ;;  %v1837_v63 = vunpack.c.h.bf16 %v633_v53 }
  0x80   : > { %476 = vmatprep.mubr.bf16.mxu0 %v1549_v7  ;;  %589 = vmatprep.mubr.bf16.mxu1 %v1549_v7 }
  0x85   : > { %1301 = vmatpush1.bf16.xpose.msra.mxu0 %v1300_v62  ;;  %1333 = vmatpush1.bf16.xpose.msra.mxu1 %v1332_v1  ;;  %v1835_v62 = vunpack.c.h.bf16 %v632_v52 }
  0x86   : > { %1303 = vmatprep.subr.bf16.mxu0 %v1302_v5  ;;  %1335 = vmatprep.subr.bf16.mxu1 %v1334_v9  ;;  %v635_v5 = vld [vmem:[%s1702_s6 + $0x28] sm:$0xff] }
  0x87   : > { %1267 = vmatmul.mubr.msk.bf16.gmra.mrb[16].mxu0 %vm379_vm0, %v1411_v14  ;;  %1275 = vmatmul.mubr.msk.bf16.gmra.mrb[16].mxu1 %vm379_vm0, %v1411_v14  ;;  %v936_v14 = vld [vmem:[%s1708_s18 + $0x148] sm:$0xff] }
  0x88   : > { %486 = vmatprep.mubr.bf16.mxu0 %v1549_v7  ;;  %599 = vmatprep.mubr.bf16.mxu1 %v1549_v7 }
  0x8d   : > { %1337 = vmatpush1.bf16.xpose.msra.mxu1 %v1336_v13 }
  0x8f   : > { %1268 = vmatmul.mubr.msk.bf16.gmra.mrb[20].mxu0 %vm379_vm0, %v1412_v15  ;;  %1276 = vmatmul.mubr.msk.bf16.gmra.mrb[20].mxu1 %vm379_vm0, %v1412_v15  ;;  %v940_v15 = vld [vmem:[%s1708_s18 + $0x168] sm:$0xff] }
  0x90   : > { %496 = vmatprep.mubr.bf16.mxu0 %v1549_v7  ;;  %609 = vmatprep.mubr.bf16.mxu1 %v1549_v7 }
  0x97   : > { %1269 = vmatmul.mubr.msk.bf16.gmra.mrb[24].mxu0 %vm379_vm0, %v1413_v16  ;;  %1277 = vmatmul.mubr.msk.bf16.gmra.mrb[24].mxu1 %vm379_vm0, %v1413_v16  ;;  %v938_v16 = vld [vmem:[%s1708_s18 + $0x158] sm:$0xff] }
  0x98   : > { %506 = vmatprep.mubr.bf16.mxu0 %v1549_v7  ;;  %619 = vmatprep.mubr.bf16.mxu1 %v1549_v7  ;;  %v927_v7 = vld [vmem:[%s1708_s18 + $0x100] sm:$0xff]  ;;  %v1338_v21 = vpack.c.bf16 %v942_v18, %v938_v16  ;;  %v636_v16 = vld [vmem:[%s1702_s6 + $0x30] sm:$0xff] }
  0x99   : > { %v1304_v10 = vpack.c.bf16 %v931_v8, %v927_v7  ;;  %v1859_v26 = vunpack.c.l.bf16 %v636_v16  ;;  %v1863_v30 = vunpack.c.h.bf16 %v636_v16 }
  0x9a   : > { %1339 = vmatprep.subr.bf16.mxu1 %v1338_v21  ;;  %v1853_v21 = vunpack.c.l.bf16 %v635_v5 }
  0x9b   : > { %1305 = vmatpush1.bf16.xpose.msra.mxu0 %v1304_v10  ;;  %1341 = vmatpush1.bf16.xpose.msra.mxu1 %v1340_v25  ;;  %v1857_v25 = vunpack.c.h.bf16 %v635_v5 }
  0x9c   : > { %1343 = vmatprep.subr.bf16.mxu1 %v1342_v33 }
  0x9f   : > { %1270 = vmatmul.mubr.msk.bf16.gmra.mrb[28].mxu0 %vm379_vm0, %v1414_v17  ;;  %1278 = vmatmul.mubr.msk.bf16.gmra.mrb[28].mxu1 %vm379_vm0, %v1414_v17  ;;  %v1306_v17 = vpack.c.bf16 %v940_v15, %v936_v14 }
  0xa1   : > { %1307 = vmatprep.subr.bf16.mxu0 %v1306_v17  ;;  %v637_v17 = vld [vmem:[%s1702_s6 + $0x38] sm:$0xff]  ;;  %s1551_s6 = smov [#allocation8]  }
  0xa2   : > { %v1861_v27 = vunpack.c.l.bf16 %v637_v17  ;;  %v1865_v31 = vunpack.c.h.bf16 %v637_v17  ;;  %s1143_s26 = sshll.u32 %s1551_s6, 4  ;;  %s1144_s26 = int_to_ptr.vmem [resolvable:$true] %s1143_s26 }
  0xa3   : > { %1309 = vmatpush1.bf16.xpose.msra.mxu0 %v1308_v22  ;;  %1345 = vmatpush1.bf16.xpose.msra.mxu1 %v1344_v37  ;;  %s1471_s28 = scalar_lea.vmem %s1144_s26, 64  ;;  %p1478_p11 = scmp.lt.s32.totalorder %s1144_s26, %s1144_s26 }
  0xa4   : > { %1311 = vmatprep.subr.bf16.mxu0 %v1310_v29  ;;  %1347 = vmatprep.subr.bf16.mxu1 %v1346_v45  ;;  %p1472_p7 = scmp.ne.s32.totalorder %s1144_s26, %s1471_s28  ;;  %p1479_p12 = scmp.lt.s32.totalorder %s1471_s28, %s1471_s28 }
  0xa6   : > { %p1473_p8 = pnand %p1472_p7, %p1358_p6  ;;  %p1480_p10 = por %p1479_p12, %p1478_p11 }
  0xa8   : > { %p1474_p9 = pneg %p1473_p8 }
  0xaa   : > { %p1481_p13 = pnand %p1480_p10, %p1474_p9 }
  0xab   : > { %1313 = vmatpush1.bf16.xpose.msra.mxu0 %v1312_v34  ;;  %1349 = vmatpush1.bf16.xpose.msra.mxu1 %v1348_v49 }
  0xac   : > { %1315 = vmatprep.subr.bf16.mxu0 %v1314_v41 }
  0xb3   : > { %1317 = vmatpush1.bf16.xpose.msra.mxu0 %v1316_v46 }
 0x13a   : > { %v438_v58 = vpop.f32.mrb[0].mxu0  ;;  %v551_v59 = vpop.f32.mrb[0].mxu1 }
 0x13b   : > { %v440_v0 = vpop.f32.mrb[1].mxu0  ;;  %v553_v1 = vpop.f32.mrb[1].mxu1  ;;  %v654_v6 = vmul.f32 %v1823_v54, %v438_v58  ;;  %v656_v7 = vmul.f32 %v1825_v55, %v551_v59 }
 0x13c   : > { %v442_v2 = vpop.f32.mrb[2].mxu0  ;;  %v555_v3 = vpop.f32.mrb[2].mxu1  ;;  %v655_v12 = vmul.f32 %v1831_v60, %v440_v0  ;;  %v657_v13 = vmul.f32 %v1833_v61, %v553_v1 }
 0x13d   : > { %v658_v8 = vmul.f32 %v1827_v56, %v442_v2  ;;  %v660_v9 = vmul.f32 %v1829_v57, %v555_v3  ;;  %v444_v10 = vpop.f32.mrb[3].mxu0  ;;  %v557_v11 = vpop.f32.mrb[3].mxu1 }
 0x13e   : > { %v659_v14 = vmul.f32 %v1835_v62, %v444_v10  ;;  %v661_v15 = vmul.f32 %v1837_v63, %v557_v11 }
 0x13f   : > { %v718_v18 = vadd.f32 %v658_v8, %v654_v6  ;;  %v736_v19 = vadd.f32 %v660_v9, %v656_v7 }
 0x140   : > { %v727_v22 = vadd.f32 %v659_v14, %v655_v12  ;;  %v745_v23 = vadd.f32 %v661_v15, %v657_v13 }
 0x142   : > { %v448_v28 = vpop.f32.mrb[4].mxu0  ;;  %v561_v29 = vpop.f32.mrb[4].mxu1 }
 0x143   : > { %v662_v32 = vmul.f32 %v1851_v20, %v448_v28  ;;  %v664_v33 = vmul.f32 %v1853_v21, %v561_v29  ;;  %v450_v34 = vpop.f32.mrb[5].mxu0  ;;  %v563_v35 = vpop.f32.mrb[5].mxu1 }
 0x144   : > { %v663_v36 = vmul.f32 %v1855_v24, %v450_v34  ;;  %v665_v37 = vmul.f32 %v1857_v25, %v563_v35  ;;  %v452_v38 = vpop.f32.mrb[6].mxu0  ;;  %v565_v39 = vpop.f32.mrb[6].mxu1 }
 0x145   : > { %v719_v40 = vadd.f32 %v718_v18, %v662_v32  ;;  %v737_v41 = vadd.f32 %v736_v19, %v664_v33  ;;  %v666_v42 = vmul.f32 %v1859_v26, %v452_v38  ;;  %v668_v43 = vmul.f32 %v1861_v27, %v565_v39  ;;  %v454_v44 = vpop.f32.mrb[7].mxu0  ;;  %v567_v45 = vpop.f32.mrb[7].mxu1 }
 0x146   : > { %v728_v46 = vadd.f32 %v727_v22, %v663_v36  ;;  %v746_v47 = vadd.f32 %v745_v23, %v665_v37  ;;  %v667_v48 = vmul.f32 %v1863_v30, %v454_v44  ;;  %v669_v49 = vmul.f32 %v1865_v31, %v567_v45 }
 0x147   : > { %v720_v50 = vadd.f32 %v719_v40, %v666_v42  ;;  %v738_v51 = vadd.f32 %v737_v41, %v668_v43 }
 0x148   : > { %v729_v52 = vadd.f32 %v728_v46, %v667_v48  ;;  %v747_v53 = vadd.f32 %v746_v47, %v669_v49 }
 0x149   : > { %v721_v58 = vrot.slane %v720_v50, 4  ;;  %v739_v59 = vrot.slane %v738_v51, 4 }
 0x14a   : > { %v730_v0 = vrot.slane %v729_v52, 4  ;;  %v748_v1 = vrot.slane %v747_v53, 4  ;;  %v458_v2 = vpop.f32.mrb[8].mxu0  ;;  %v571_v3 = vpop.f32.mrb[8].mxu1 }
 0x14b   : > { %v722_v4 = vadd.f32 %v721_v58, %v720_v50  ;;  %v740_v5 = vadd.f32 %v739_v59, %v738_v51  ;;  %v670_v6 = vmul.f32 %v1823_v54, %v458_v2  ;;  %v672_v7 = vmul.f32 %v1825_v55, %v571_v3  ;;  %v460_v8 = vpop.f32.mrb[9].mxu0  ;;  %v573_v9 = vpop.f32.mrb[9].mxu1 }
 0x14c   : > { %v731_v10 = vadd.f32 %v730_v0, %v729_v52  ;;  %v749_v11 = vadd.f32 %v748_v1, %v747_v53  ;;  %v671_v12 = vmul.f32 %v1831_v60, %v460_v8  ;;  %v673_v13 = vmul.f32 %v1833_v61, %v573_v9  ;;  %v462_v14 = vpop.f32.mrb[10].mxu0  ;;  %v575_v15 = vpop.f32.mrb[10].mxu1 }
 0x14d   : > { %v723_v16 = vrot.slane %v722_v4, 2  ;;  %v741_v17 = vrot.slane %v740_v5, 2  ;;  %v674_v18 = vmul.f32 %v1827_v56, %v462_v14  ;;  %v676_v19 = vmul.f32 %v1829_v57, %v575_v15  ;;  %v464_v22 = vpop.f32.mrb[11].mxu0  ;;  %v577_v23 = vpop.f32.mrb[11].mxu1 }
 0x14e   : > { %v732_v28 = vrot.slane %v731_v10, 2  ;;  %v750_v29 = vrot.slane %v749_v11, 2  ;;  %v675_v32 = vmul.f32 %v1835_v62, %v464_v22  ;;  %v677_v33 = vmul.f32 %v1837_v63, %v577_v23 }
 0x14f   : > { %v724_v34 = vadd.f32 %v723_v16, %v722_v4  ;;  %v742_v35 = vadd.f32 %v741_v17, %v740_v5  ;;  %v754_v36 = vadd.f32 %v674_v18, %v670_v6  ;;  %v772_v37 = vadd.f32 %v676_v19, %v672_v7 }
 0x150   : > { %v733_v38 = vadd.f32 %v732_v28, %v731_v10  ;;  %v751_v39 = vadd.f32 %v750_v29, %v749_v11  ;;  %v763_v40 = vadd.f32 %v675_v32, %v671_v12  ;;  %v781_v41 = vadd.f32 %v677_v33, %v673_v13 }
 0x151   : > { %v725_v42 = vrot.slane %v724_v34, 1  ;;  %v743_v43 = vrot.slane %v742_v35, 1 }
 0x152   : > { %v734_v44 = vrot.slane %v733_v38, 1  ;;  %v752_v45 = vrot.slane %v751_v39, 1  ;;  %v468_v46 = vpop.f32.mrb[12].mxu0  ;;  %v581_v47 = vpop.f32.mrb[12].mxu1 }
 0x153   : > { %v678_v48 = vmul.f32 %v1851_v20, %v468_v46  ;;  %v680_v49 = vmul.f32 %v1853_v21, %v581_v47  ;;  %v470_v50 = vpop.f32.mrb[13].mxu0  ;;  %v583_v51 = vpop.f32.mrb[13].mxu1  ;;  %v726_v0 = vadd.f32 %v725_v42, %v724_v34  ;;  %v744_v1 = vadd.f32 %v743_v43, %v742_v35 }
 0x154   : > { %v679_v52 = vmul.f32 %v1855_v24, %v470_v50  ;;  %v681_v53 = vmul.f32 %v1857_v25, %v583_v51  ;;  %v472_v58 = vpop.f32.mrb[14].mxu0  ;;  %v585_v59 = vpop.f32.mrb[14].mxu1  ;;  %v735_v6 = vadd.f32 %v734_v44, %v733_v38  ;;  %v753_v7 = vadd.f32 %v752_v45, %v751_v39 }
 0x155   : > { %v755_v2 = vadd.f32 %v754_v36, %v678_v48  ;;  %v773_v3 = vadd.f32 %v772_v37, %v680_v49  ;;  %v474_v4 = vpop.f32.mrb[15].mxu0  ;;  %v587_v5 = vpop.f32.mrb[15].mxu1  ;;  %v682_v10 = vmul.f32 %v1859_v26, %v472_v58  ;;  %v684_v11 = vmul.f32 %v1861_v27, %v585_v59 }
 0x156   : > { %v764_v8 = vadd.f32 %v763_v40, %v679_v52  ;;  %v782_v9 = vadd.f32 %v781_v41, %v681_v53  ;;  %v683_v12 = vmul.f32 %v1863_v30, %v474_v4  ;;  %v685_v13 = vmul.f32 %v1865_v31, %v587_v5 }
 0x157   : > { %vm862_vm1 = vcmp.gt.f32.partialorder %v726_v0, 0.0  ;;  %vm864_vm2 = vcmp.gt.f32.partialorder %v744_v1, 0.0  ;;  %v756_v14 = vadd.f32 %v755_v2, %v682_v10  ;;  %v774_v15 = vadd.f32 %v773_v3, %v684_v11 }
 0x158   : > { %vm863_vm3 = vcmp.gt.f32.partialorder %v735_v6, 0.0  ;;  %vm865_vm4 = vcmp.gt.f32.partialorder %v753_v7, 0.0  ;;  %v765_v16 = vadd.f32 %v764_v8, %v683_v12  ;;  %v783_v17 = vadd.f32 %v782_v9, %v685_v13 }
 0x159   : > { %v757_v22 = vrot.slane %v756_v14, 4  ;;  %v775_v23 = vrot.slane %v774_v15, 4  ;;  %v1550_v4 = vmov -1.0  }
 0x15a   : > { %v478_v18 = vpop.f32.mrb[16].mxu0  ;;  %v591_v19 = vpop.f32.mrb[16].mxu1  ;;  %v766_v34 = vrot.slane %v765_v16, 4  ;;  %v784_v35 = vrot.slane %v783_v17, 4  ;;  %v878_v5 = vsel %vm862_vm1, 1.0, %v1550_v4  ;;  %v880_v8 = vsel %vm864_vm2, 1.0, %v1550_v4 }
 0x15b   : > { %v686_v28 = vmul.f32 %v1823_v54, %v478_v18  ;;  %v688_v29 = vmul.f32 %v1825_v55, %v591_v19  ;;  %v480_v32 = vpop.f32.mrb[17].mxu0  ;;  %v593_v33 = vpop.f32.mrb[17].mxu1  ;;  %v758_v40 = vadd.f32 %v757_v22, %v756_v14  ;;  %v776_v41 = vadd.f32 %v775_v23, %v774_v15 }
 0x15c   : > { %v687_v36 = vmul.f32 %v1831_v60, %v480_v32  ;;  %v689_v37 = vmul.f32 %v1833_v61, %v593_v33  ;;  %v482_v38 = vpop.f32.mrb[18].mxu0  ;;  %v595_v39 = vpop.f32.mrb[18].mxu1  ;;  %v767_v46 = vadd.f32 %v766_v34, %v765_v16  ;;  %v785_v47 = vadd.f32 %v784_v35, %v783_v17 }
 0x15d   : > { %v690_v42 = vmul.f32 %v1827_v56, %v482_v38  ;;  %v692_v43 = vmul.f32 %v1829_v57, %v595_v39  ;;  %v484_v44 = vpop.f32.mrb[19].mxu0  ;;  %v597_v45 = vpop.f32.mrb[19].mxu1  ;;  %v759_v50 = vrot.slane %v758_v40, 2  ;;  %v777_v51 = vrot.slane %v776_v41, 2 }
 0x15e   : > { %v691_v48 = vmul.f32 %v1835_v62, %v484_v44  ;;  %v693_v49 = vmul.f32 %v1837_v63, %v597_v45  ;;  %v768_v58 = vrot.slane %v767_v46, 2  ;;  %v786_v59 = vrot.slane %v785_v47, 2 }
 0x15f   : > { %v790_v52 = vadd.f32 %v690_v42, %v686_v28  ;;  %v808_v53 = vadd.f32 %v692_v43, %v688_v29  ;;  %v760_v9 = vadd.f32 %v759_v50, %v758_v40  ;;  %v778_v10 = vadd.f32 %v777_v51, %v776_v41 }
 0x160   : > { %v799_v2 = vadd.f32 %v691_v48, %v687_v36  ;;  %v817_v3 = vadd.f32 %v693_v49, %v689_v37  ;;  %v769_v11 = vadd.f32 %v768_v58, %v767_v46  ;;  %v787_v12 = vadd.f32 %v786_v59, %v785_v47 }
 0x161   : > { %v1905_v15 = vsel %vm863_vm3, 1.0, %v1550_v4  ;;  %v1909_v16 = vsel %vm865_vm4, 1.0, %v1550_v4  ;;  %v761_v17 = vrot.slane %v760_v9, 1  ;;  %v779_v0 = vrot.slane %v778_v10, 1 }
 0x162   : > { %v488_v13 = vpop.f32.mrb[20].mxu0  ;;  %v601_v14 = vpop.f32.mrb[20].mxu1  ;;  %v770_v23 = vrot.slane %v769_v11, 1  ;;  %v788_v28 = vrot.slane %v787_v12, 1 }
 0x163   : > { %v694_v18 = vmul.f32 %v1851_v20, %v488_v13  ;;  %v696_v1 = vmul.f32 %v1853_v21, %v601_v14  ;;  %v490_v19 = vpop.f32.mrb[21].mxu0  ;;  %v603_v22 = vpop.f32.mrb[21].mxu1  ;;  %v762_v34 = vadd.f32 %v761_v17, %v760_v9  ;;  %v780_v7 = vadd.f32 %v779_v0, %v778_v10 }
 0x164   : > { %v695_v29 = vmul.f32 %v1855_v24, %v490_v19  ;;  %v697_v6 = vmul.f32 %v1857_v25, %v603_v22  ;;  %v492_v32 = vpop.f32.mrb[22].mxu0  ;;  %v605_v33 = vpop.f32.mrb[22].mxu1  ;;  %v771_v39 = vadd.f32 %v770_v23, %v769_v11  ;;  %v789_v40 = vadd.f32 %v788_v28, %v787_v12 }
 0x165   : > { %v791_v35 = vadd.f32 %v790_v52, %v694_v18  ;;  %v809_v36 = vadd.f32 %v808_v53, %v696_v1  ;;  %v494_v37 = vpop.f32.mrb[23].mxu0  ;;  %v607_v38 = vpop.f32.mrb[23].mxu1  ;;  %vm866_vm6 = vcmp.gt.f32.partialorder %v762_v34, 0.0  ;;  %vm868_vm7 = vcmp.gt.f32.partialorder %v780_v7, 0.0 }
 0x166   : > { %v800_v41 = vadd.f32 %v799_v2, %v695_v29  ;;  %v818_v42 = vadd.f32 %v817_v3, %v697_v6  ;;  %v698_v43 = vmul.f32 %v1859_v26, %v492_v32  ;;  %v700_v44 = vmul.f32 %v1861_v27, %v605_v33 }
 0x167   : > { %v882_v45 = vsel %vm866_vm6, 1.0, %v1550_v4  ;;  %v884_v46 = vsel %vm868_vm7, 1.0, %v1550_v4  ;;  %vm867_vm8 = vcmp.gt.f32.partialorder %v771_v39, 0.0  ;;  %vm869_vm9 = vcmp.gt.f32.partialorder %v789_v40, 0.0 }
 0x168   : > { %v792_v47 = vadd.f32 %v791_v35, %v698_v43  ;;  %v810_v48 = vadd.f32 %v809_v36, %v700_v44  ;;  %v699_v49 = vmul.f32 %v1863_v30, %v494_v37  ;;  %v701_v50 = vmul.f32 %v1865_v31, %v607_v38 }
 0x169   : > { %v883_v53 = vsel %vm867_vm8, 1.0, %v1550_v4  ;;  %v885_v58 = vsel %vm869_vm9, 1.0, %v1550_v4  ;;  %v1924_v59 = vsel %vm975_vm5, %v882_v45, %v878_v5  ;;  %v1927_v2 = vsel %vm975_vm5, %v884_v46, %v880_v8 }
 0x16a   : > { %v498_v51 = vpop.f32.mrb[24].mxu0  ;;  %v611_v52 = vpop.f32.mrb[24].mxu1  ;;  %v793_v3 = vrot.slane %v792_v47, 4  ;;  %v811_v9 = vrot.slane %v810_v48, 4  ;;  %v801_v10 = vadd.f32 %v800_v41, %v699_v49  ;;  %v819_v11 = vadd.f32 %v818_v42, %v701_v50 }
 0x16b   : > { %v500_v12 = vpop.f32.mrb[25].mxu0  ;;  %v613_v13 = vpop.f32.mrb[25].mxu1  ;;  %v702_v14 = vmul.f32 %v1823_v54, %v498_v51  ;;  %v704_v17 = vmul.f32 %v1825_v55, %v611_v52 }
 0x16c   : > { %v703_v0 = vmul.f32 %v1831_v60, %v500_v12  ;;  %v705_v18 = vmul.f32 %v1833_v61, %v613_v13  ;;  %v502_v1 = vpop.f32.mrb[26].mxu0  ;;  %v615_v5 = vpop.f32.mrb[26].mxu1  ;;  %v794_v19 = vadd.f32 %v793_v3, %v792_v47  ;;  %v812_v22 = vadd.f32 %v811_v9, %v810_v48 }
 0x16d   : > { %v802_v8 = vrot.slane %v801_v10, 4  ;;  %v820_v23 = vrot.slane %v819_v11, 4  ;;  %v504_v28 = vpop.f32.mrb[27].mxu0  ;;  %v617_v29 = vpop.f32.mrb[27].mxu1  ;;  %v706_v6 = vmul.f32 %v1827_v56, %v502_v1  ;;  %v708_v32 = vmul.f32 %v1829_v57, %v615_v5 }
 0x16e   : > { %v707_v54 = vmul.f32 %v1835_v62, %v504_v28  ;;  %v709_v55 = vmul.f32 %v1837_v63, %v617_v29  ;;  %v795_v33 = vrot.slane %v794_v19, 2  ;;  %v813_v60 = vrot.slane %v812_v22, 2 }
 0x16f   : > { %v803_v34 = vadd.f32 %v802_v8, %v801_v10  ;;  %v821_v61 = vadd.f32 %v820_v23, %v819_v11  ;;  %v826_v7 = vadd.f32 %v706_v6, %v702_v14  ;;  %v844_v35 = vadd.f32 %v708_v32, %v704_v17 }
 0x170   : > { %v835_v36 = vadd.f32 %v707_v54, %v703_v0  ;;  %v853_v37 = vadd.f32 %v709_v55, %v705_v18  ;;  %v796_v38 = vadd.f32 %v795_v33, %v794_v19  ;;  %v814_v39 = vadd.f32 %v813_v60, %v812_v22 }
 0x171   : > { %v804_v40 = vrot.slane %v803_v34, 2  ;;  %v822_v41 = vrot.slane %v821_v61, 2  ;;  %v981_v57 = vsel %vm975_vm5, %v883_v53, %v1905_v15  ;;  %v987_v62 = vsel %vm975_vm5, %v885_v58, %v1909_v16 }
 0x172   : > { %v508_v42 = vpop.f32.mrb[28].mxu0  ;;  %v621_v56 = vpop.f32.mrb[28].mxu1  ;;  %v797_v63 = vrot.slane %v796_v38, 1  ;;  %v815_v43 = vrot.slane %v814_v39, 1 }
 0x173   : > { %v805_v44 = vadd.f32 %v804_v40, %v803_v34  ;;  %v823_v45 = vadd.f32 %v822_v41, %v821_v61  ;;  %v510_v46 = vpop.f32.mrb[29].mxu0  ;;  %v623_v47 = vpop.f32.mrb[29].mxu1  ;;  %v710_v48 = vmul.f32 %v1851_v20, %v508_v42  ;;  %v712_v49 = vmul.f32 %v1853_v21, %v621_v56 }
 0x174   : > { %v711_v50 = vmul.f32 %v1855_v24, %v510_v46  ;;  %v713_v51 = vmul.f32 %v1857_v25, %v623_v47  ;;  %v512_v52 = vpop.f32.mrb[30].mxu0  ;;  %v625_v3 = vpop.f32.mrb[30].mxu1  ;;  %v798_v15 = vadd.f32 %v797_v63, %v796_v38  ;;  %v816_v53 = vadd.f32 %v815_v43, %v814_v39 }
 0x175   : > { %v806_v9 = vrot.slane %v805_v44, 1  ;;  %v824_v16 = vrot.slane %v823_v45, 1  ;;  %v514_v58 = vpop.f32.mrb[31].mxu0  ;;  %v627_v10 = vpop.f32.mrb[31].mxu1  ;;  %v827_v11 = vadd.f32 %v826_v7, %v710_v48  ;;  %v845_v12 = vadd.f32 %v844_v35, %v712_v49 }
 0x176   : > { %v836_v13 = vadd.f32 %v835_v36, %v711_v50  ;;  %v854_v14 = vadd.f32 %v853_v37, %v713_v51  ;;  %vm870_vm11 = vcmp.gt.f32.partialorder %v798_v15, 0.0  ;;  %vm872_vm12 = vcmp.gt.f32.partialorder %v816_v53, 0.0 }
 0x177   : > { %v714_v20 = vmul.f32 %v1859_v26, %v512_v52  ;;  %v716_v21 = vmul.f32 %v1861_v27, %v625_v3  ;;  %v886_v24 = vsel %vm870_vm11, 1.0, %v1550_v4  ;;  %v888_v25 = vsel %vm872_vm12, 1.0, %v1550_v4  ;;  %v894_v52 = vld [vmem:[#allocation8] sm:$0xf] }
 0x178   : > { %v715_v17 = vmul.f32 %v1863_v30, %v514_v58  ;;  %v717_v0 = vmul.f32 %v1865_v31, %v627_v10  ;;  %v807_v5 = vadd.f32 %v806_v9, %v805_v44  ;;  %v825_v19 = vadd.f32 %v824_v16, %v823_v45 }
 0x179   : > { %v828_v18 = vadd.f32 %v827_v11, %v714_v20  ;;  %v846_v1 = vadd.f32 %v845_v12, %v716_v21  ;;  %v978_v23 = vsel %vm977_vm10, %v886_v24, %v1924_v59  ;;  %v985_v26 = vsel %vm977_vm10, %v888_v25, %v1927_v2 }
 0x17a   : > { %v837_v22 = vadd.f32 %v836_v13, %v715_v17  ;;  %v855_v8 = vadd.f32 %v854_v14, %v717_v0  ;;  %vm871_vm13 = vcmp.gt.f32.partialorder %v807_v5, 0.0  ;;  %vm873_vm14 = vcmp.gt.f32.partialorder %v825_v19, 0.0 }
 0x17b   : > { %v829_v27 = vrot.slane %v828_v18, 4  ;;  %v847_v28 = vrot.slane %v846_v1, 4  ;;  %v887_v31 = vsel %vm871_vm13, 1.0, %v1550_v4  ;;  %v889_v6 = vsel %vm873_vm14, 1.0, %v1550_v4 }
 0x17c   : > { %v838_v29 = vrot.slane %v837_v22, 4  ;;  %v856_v30 = vrot.slane %v855_v8, 4  ;;  %v982_v55 = vsel %vm977_vm10, %v887_v31, %v981_v57  ;;  %v988_v33 = vsel %vm977_vm10, %v889_v6, %v987_v62 }
 0x17d   : > { %v830_v32 = vadd.f32 %v829_v27, %v828_v18  ;;  %v848_v54 = vadd.f32 %v847_v28, %v846_v1 }
 0x17e   : > { %v839_v59 = vadd.f32 %v838_v29, %v837_v22  ;;  %v857_v60 = vadd.f32 %v856_v30, %v855_v8 }
 0x17f   : > { %v831_v34 = vrot.slane %v830_v32, 2  ;;  %v849_v2 = vrot.slane %v848_v54, 2 }
 0x180   : > { %v840_v61 = vrot.slane %v839_v59, 2  ;;  %v858_v7 = vrot.slane %v857_v60, 2 }
 0x181   : > { %v832_v35 = vadd.f32 %v831_v34, %v830_v32  ;;  %v850_v36 = vadd.f32 %v849_v2, %v848_v54 }
 0x182   : > { %v841_v37 = vadd.f32 %v840_v61, %v839_v59  ;;  %v859_v38 = vadd.f32 %v858_v7, %v857_v60 }
 0x183   : > { %v833_v39 = vrot.slane %v832_v35, 1  ;;  %v851_v40 = vrot.slane %v850_v36, 1 }
 0x184   : > { %v842_v41 = vrot.slane %v841_v37, 1  ;;  %v860_v42 = vrot.slane %v859_v38, 1 }
 0x185   : > { %v834_v56 = vadd.f32 %v833_v39, %v832_v35  ;;  %v852_v63 = vadd.f32 %v851_v40, %v850_v36 }
 0x186   : > { %v843_v43 = vadd.f32 %v842_v41, %v841_v37  ;;  %v861_v57 = vadd.f32 %v860_v42, %v859_v38 }
 0x187   : > { %vm874_vm0 = vcmp.gt.f32.partialorder %v834_v56, 0.0  ;;  %vm876_vm1 = vcmp.gt.f32.partialorder %v852_v63, 0.0 }
 0x188   : > { %vm875_vm2 = vcmp.gt.f32.partialorder %v843_v43, 0.0  ;;  %vm877_vm3 = vcmp.gt.f32.partialorder %v861_v57, 0.0  ;;  %v890_v62 = vsel %vm874_vm0, 1.0, %v1550_v4  ;;  %v892_v44 = vsel %vm876_vm1, 1.0, %v1550_v4 }
 0x189   : > { %v891_v45 = vsel %vm875_vm2, 1.0, %v1550_v4  ;;  %v893_v46 = vsel %vm877_vm3, 1.0, %v1550_v4  ;;  %v980_v47 = vsel %vm979_vm15, %v890_v62, %v978_v23  ;;  %v986_v48 = vsel %vm979_vm15, %v892_v44, %v985_v26 }
 0x18a   : > { %v983_v49 = vsel %vm979_vm15, %v891_v45, %v982_v55  ;;  %v989_v50 = vsel %vm979_vm15, %v893_v46, %v988_v33 }
 0x18b   : > { %1058 = vmatprep.mubr.f32.mxu0 %v983_v49  ;;  %1128 = vmatprep.mubr.f32.mxu1 %v989_v50 }
 0x18c   : > { %1059 = vmatmul.mubr.f32.vlgmr.msra.gmra.mrb[32].mxu0 %v980_v47  ;;  %1129 = vmatmul.mubr.f32.vlgmr.msra.gmra.mrb[32].mxu1 %v986_v48 }
 0x25f   : > { %v1060_v51 = vpop.f32.mrb[32].mxu0  ;;  %v1130_v3 = vpop.f32.mrb[32].mxu1 }
 0x260   : > { %v1131_v15 = vadd.f32 %v1130_v3, %v1060_v51  ;;  %v1062_v53 = vpop.f32.mrb[33].mxu0  ;;  %v1132_v9 = vpop.f32.mrb[33].mxu1 }
 0x262   : > { %v1134_v4 = vadd.f32 %v1131_v15, %v894_v52 }
 0x264   : > { %1135 = vst [vmem:[#allocation8] sm:$0xf] %v1134_v4 }
 0x265   : > { %1484 = shalt.err (!%p1481_p13)
}
 0x266   : > { %s1485_s22 = scalar_lea.hbm %s2003_s4, 64 }
 0x267   : > { %p1486_p1 = scmp.ne.s32.totalorder %s2003_s4, %s1485_s22  ;;  %p1491_p3 = scmp.lt.u32.totalorder %s1485_s22, %s2003_s4 }
 0x269   : > { %p1487_p2 = pnand %p1486_p1, %p1358_p6 }
 0x26b   : > { %p1488_p0 = pneg %p1487_p2 }
 0x26d   : > { %p1493_p5 = pnand %p1491_p3, %p1488_p0 }
 0x26f   : > { %1496 = shalt.err (!%p1493_p5)
}
 0x270   : > { %1355 = dma.vmem_to_hbm [thread:$0]  (%p1358_p6), %s1144_s26, 64, %s2003_s4, [#allocation4]  }
 0x271   : > { %1522 = dma.done.wait (%p1358_p6), [#allocation4], 64  }
 0x272   : > { %1524 = vsyncadd (%p1358_p6), [#allocation4], 4294967232 }
 0x273 PF: > { %p18_p4 = scmp.ge.s32.totalorder %s1599_s20, 4   ;;  %s2006_s15 = smov %s1531_s16 }
 0x274   : > { %s2007_s16 = smov %s1535_s17  ;;  %s2008_s17 = smov %s1609_s23 }
 0x275   : > { %s2009_s18 = smov %s1599_s20  ;;  %20 = sbr.rel (!%p18_p4) target bundleno = 6 (0x6), region = 121 }
 0x27c   :  { %1156 = vsyncpa [#allocation3], 1 }
 0x27d   :  { %1158 = vsyncpa [#allocation3 + $0x1], 1 }
 0x27e   :  { %1159 = vsyncpa [#allocation7], 1 }
 0x27f   :  { %1161 = vsyncpa [#allocation7 + $0x1], 1 }
 0x280   :  { %1162 = vsyncpa [#allocation4], 1 }
 0x281   :  { %1164 = vsyncpa [#allocation4 + $0x1], 1 }

</bundles_post_ra>
